<compile_context>
chip_gen: v7x
topology: tpu7x:2x2x1
jax: 0.10.0
libtpu: 0.0.40
codegen_flags: <defaults>
</compile_context>

<pallas_src>
import jax
import jax.numpy as jnp
import numpy as np
from jax.experimental import pallas as pl
from jax.experimental.pallas import tpu as pltpu


def _fused_cross_attention_kernel(v_ref, w_ref, b_ref, out_ref):
    # out = value @ (Wv @ Wo) + (bv @ Wo + bo); f32 accumulation on the MXU.
    out_ref[...] = (
        jnp.dot(v_ref[...], w_ref[...], preferred_element_type=jnp.float32)
        + b_ref[...]
    ).astype(out_ref.dtype)


def cross_attention_pallas(query, key, value, params, *, num_heads):
    """query: (B, Dq), key: (B, Dk), value: (B, Dv) -> (B, hidden).

    `query`, `key` and `num_heads` are kept for API parity with the PyTorch
    module, but for its fixed seq_len == 1 the attention weights are
    identically 1, so the output does not depend on them.
    """
    del query, key, num_heads  # dead for seq_len == 1 (softmax over one key == 1)

    wq, bq, wk, bk, wv, bv, wo, bo = params
    del wq, bq, wk, bk  # dead for seq_len == 1

    B, Dv = value.shape
    hidden = wo.shape[1]

    # Host-side (parameter-only) fusion of the two remaining projections.
    w_fused = jnp.dot(wv, wo, preferred_element_type=jnp.float32)       # (Dv, hidden)
    b_fused = jnp.dot(bv, wo, preferred_element_type=jnp.float32) + bo  # (1, hidden)
    # TODO(synk): for large hidden_dim on v6e/v7x cast w_fused to bfloat16 here
    # (halves weight DMA bytes; keep preferred_element_type=f32 in the kernel),
    # and tile the hidden (N) axis so the weight tile stays under v7x's 64 MiB VMEM.

    # Batch tiling: a single "parallel" grid axis so Mosaic can shard across
    # TensorCores when B is large; for small B this is one grid step.
    bm = 256 if (B > 256 and B % 256 == 0) else B
    grid = (B // bm,)

    return pl.pallas_call(
        _fused_cross_attention_kernel,
        out_shape=jax.ShapeDtypeStruct((B, hidden), jnp.float32),
        grid=grid,
        in_specs=[
            pl.BlockSpec((bm, Dv), lambda i: (i, 0)),       # value tile
            pl.BlockSpec((Dv, hidden), lambda i: (0, 0)),   # fused weight (resident)
            pl.BlockSpec((1, hidden), lambda i: (0, 0)),    # fused bias   (resident)
        ],
        out_specs=pl.BlockSpec((bm, hidden), lambda i: (i, 0)),
        compiler_params=pltpu.CompilerParams(
            dimension_semantics=("parallel",)),
    )(value, w_fused, b_fused)


def cross_attention_reference(query, key, value, params, *, num_heads):
    """Plain-JAX mirror of the full PyTorch forward (eval mode, no dropout)."""
    wq, bq, wk, bk, wv, bv, wo, bo = params
    B = query.shape[0]
    hidden = wq.shape[1]
    head_dim = hidden // num_heads
    scale = float(head_dim) ** -0.5

    q = query @ wq + bq
    k = key @ wk + bk
    v = value @ wv + bv
    q = q.reshape(B, 1, num_heads, head_dim).transpose(0, 2, 1, 3)
    k = k.reshape(B, 1, num_heads, head_dim).transpose(0, 2, 1, 3)
    v = v.reshape(B, 1, num_heads, head_dim).transpose(0, 2, 1, 3)
    scores = jnp.einsum("bhqd,bhkd->bhqk", q, k) * scale
    attn = jax.nn.softmax(scores, axis=-1)
    out = jnp.einsum("bhqk,bhkd->bhqd", attn, v)
    out = out.transpose(0, 2, 1, 3).reshape(B, 1, hidden)
    out = out @ wo + bo
    return out[:, 0, :]


if __name__ == "__main__":
    # Small shapes consistent with the module.
    B = 8
    query_dim, key_dim, value_dim = 16, 24, 20
    hidden_dim, num_heads = 32, 4

    root = jax.random.PRNGKey(0)
    keys = jax.random.split(root, 12)

    query = jax.random.normal(keys[0], (B, query_dim), jnp.float32)
    key = jax.random.normal(keys[1], (B, key_dim), jnp.float32)
    value = jax.random.normal(keys[2], (B, value_dim), jnp.float32)

    def lin(kw, kb, din, dout):
        # deterministic init; stored as (din, dout) so projections are x @ W
        w = jax.random.normal(kw, (din, dout), jnp.float32) * (1.0 / np.sqrt(din))
        b = jax.random.normal(kb, (1, dout), jnp.float32) * 0.01
        return w, b

    wq, bq = lin(keys[3], keys[4], query_dim, hidden_dim)
    wk, bk = lin(keys[5], keys[6], key_dim, hidden_dim)
    wv, bv = lin(keys[7], keys[8], value_dim, hidden_dim)
    wo, bo = lin(keys[9], keys[10], hidden_dim, hidden_dim)
    params = (wq, bq, wk, bk, wv, bv, wo, bo)

    out = cross_attention_pallas(query, key, value, params, num_heads=num_heads)
    out = jax.block_until_ready(out)

    ref = cross_attention_reference(query, key, value, params, num_heads=num_heads)
    np.testing.assert_allclose(np.asarray(out), np.asarray(ref), rtol=1e-4, atol=1e-4)

    print("KERNEL_OK")
</pallas_src>

<mosaic_0001>
module attributes {stable_mosaic.version = 11 : i64} {
  func.func @_fused_cross_attention_kernel(%arg0: i32, %arg1: memref<8x20xf32, #tpu.memory_space<vmem>>, %arg2: memref<20x32xf32, #tpu.memory_space<vmem>>, %arg3: memref<1x32xf32, #tpu.memory_space<vmem>>, %arg4: memref<8x32xf32, #tpu.memory_space<vmem>>) attributes {dimension_semantics = [#tpu.dimension_semantics<parallel>], iteration_bounds = array<i64: 1>, scalar_prefetch = 0 : i64, scratch_operands = 0 : i64, tpu.core_type = #tpu.core_type<tc>, window_params = [{transform_indices = @transform_0, window_bounds = array<i64: 8, 20>}, {pipeline_mode = #tpu.pipeline_mode<synchronous>, transform_indices = @transform_1, window_bounds = array<i64: 20, 32>}, {pipeline_mode = #tpu.pipeline_mode<synchronous>, transform_indices = @transform_2, window_bounds = array<i64: 1, 32>}, {transform_indices = @transform_3, window_bounds = array<i64: 8, 32>}]} {
    %c0 = arith.constant 0 : index
    %c0_0 = arith.constant 0 : index
    %0 = vector.load %arg1[%c0, %c0_0] : memref<8x20xf32, #tpu.memory_space<vmem>>, vector<8x20xf32>
    %c0_1 = arith.constant 0 : index
    %c0_2 = arith.constant 0 : index
    %1 = vector.load %arg2[%c0_1, %c0_2] : memref<20x32xf32, #tpu.memory_space<vmem>>, vector<20x32xf32>
    %cst = arith.constant dense<0.000000e+00> : vector<8x32xf32>
    %2 = tpu.matmul %0, %1, %cst {dimension_numbers = #tpu.dot_dimension_numbers<[1], [0], [0], [1], [0, 0, 1, 1], [], []>} : vector<8x20xf32>, vector<20x32xf32>, vector<8x32xf32> -> vector<8x32xf32>
    %c0_3 = arith.constant 0 : index
    %c0_4 = arith.constant 0 : index
    %3 = vector.load %arg3[%c0_3, %c0_4] : memref<1x32xf32, #tpu.memory_space<vmem>>, vector<1x32xf32>
    %4 = vector.broadcast %3 : vector<1x32xf32> to vector<8x32xf32>
    %5 = arith.addf %2, %4 : vector<8x32xf32>
    %c0_5 = arith.constant 0 : index
    %c0_6 = arith.constant 0 : index
    %6 = vector.load %arg4[%c0_5, %c0_6] : memref<8x32xf32, #tpu.memory_space<vmem>>, vector<8x32xf32>
    tpu.vector_store %arg4[%c0_5, %c0_6], %5 {strides = array<i32>} : memref<8x32xf32, #tpu.memory_space<vmem>>, vector<8x32xf32>,
    return
  }
  func.func @transform_0(%arg0: i32) -> (i32, i32) {
    %c0_i32 = arith.constant 0 : i32
    %c0_i32_0 = arith.constant 0 : i32
    return %arg0, %c0_i32 : i32, i32
  }
  func.func @transform_1(%arg0: i32) -> (i32, i32) {
    %c0_i32 = arith.constant 0 : i32
    %c0_i32_0 = arith.constant 0 : i32
    %c0_i32_1 = arith.constant 0 : i32
    return %c0_i32, %c0_i32_0 : i32, i32
  }
  func.func @transform_2(%arg0: i32) -> (i32, i32) {
    %c0_i32 = arith.constant 0 : i32
    %c0_i32_0 = arith.constant 0 : i32
    %c0_i32_1 = arith.constant 0 : i32
    return %c0_i32, %c0_i32_0 : i32, i32
  }
  func.func @transform_3(%arg0: i32) -> (i32, i32) {
    %c0_i32 = arith.constant 0 : i32
    %c0_i32_0 = arith.constant 0 : i32
    return %arg0, %c0_i32 : i32, i32
  }
}

</mosaic_0001>

<bundles_post_ra>
// kernel: tpu_custom_call.1
= control target key start
LH: loop header
LB: loop body
LE: loop exit
PB: predicated region body
PF: predicated region fallthrough
CT: control target
= control target key end

     0   :  { %8 = vsyncpa [#allocation3], 0  ;;  %s321_s0 = inlined_call_operand.hbm [shape: f32[8,20], index: 0, kind: input, shape index: {}]   ;;  %s322_s1 = inlined_call_operand.hbm [shape: f32[20,32], index: 1, kind: input, shape index: {}]   ;;  %s323_s2 = inlined_call_operand.vmem [shape: f32[1,32], index: 2, kind: input, shape index: {}]   ;;  %s324_s3 = inlined_call_operand.hbm [shape: f32[8,32], index: 3, kind: output, shape index: {}]  }
   0x1   :  { %9 = vsyncpa [#allocation6], 0 }
   0x2   :  { %10 = vsyncpa [#allocation4], 0  ;;  %s247_s12 = smov [#allocation2]   ;;  %s248_s14 = smov [#allocation5]  }
   0x3   :  { %s17_s13 = sshll.u32 %s247_s12, 4  ;;  %s26_s15 = sshll.u32 %s248_s14, 4  ;;  %s18_s13 = int_to_ptr.vmem [resolvable:$true] %s17_s13  ;;  %s275_s15 = int_to_ptr.vmem [resolvable:$true] %s26_s15 }
   0x4   :  { %s175_s18 = scalar_lea.hbm %s321_s0, 128 }
   0x5   :  { %p176_p0 = scmp.ne.s32.totalorder %s321_s0, %s175_s18  ;;  %p179_p1 = scmp.lt.u32.totalorder %s175_s18, %s321_s0 }
   0x7   :  { %p181_p2 = pnand %p179_p1, %p176_p0 }
   0x9   :  { %184 = shalt.err (!%p181_p2)
}
   0xa   :  { %s185_s23 = scalar_lea.vmem %s18_s13, 128  ;;  %p190_p4 = scmp.lt.s32.totalorder %s18_s13, %s18_s13 }
   0xb   :  { %p186_p3 = scmp.ne.s32.totalorder %s18_s13, %s185_s23  ;;  %p191_p5 = scmp.lt.s32.totalorder %s185_s23, %s185_s23 }
   0xd   :  { %p192_p6 = por %p191_p5, %p190_p4 }
   0xf   :  { %p193_p7 = pnand %p192_p6, %p186_p3 }
  0x11   :  { %196 = shalt.err (!%p193_p7)
}
  0x12   :  { %20 = dma.hbm_to_vmem [thread:$0]  %s321_s0, 128, %s18_s13, [#allocation3]  }
  0x13   :  { %s197_s28 = scalar_lea.hbm %s322_s1, 384 }
  0x14   :  { %p198_p8 = scmp.ne.s32.totalorder %s322_s1, %s197_s28  ;;  %p201_p9 = scmp.lt.u32.totalorder %s197_s28, %s322_s1 }
  0x16   :  { %p203_p10 = pnand %p201_p9, %p198_p8 }
  0x18   :  { %206 = shalt.err (!%p203_p10)
}
  0x19   :  { %s207_s6 = scalar_lea.vmem %s275_s15, 384  ;;  %p212_p12 = scmp.lt.s32.totalorder %s275_s15, %s275_s15 }
  0x1a   :  { %p208_p11 = scmp.ne.s32.totalorder %s275_s15, %s207_s6  ;;  %p213_p13 = scmp.lt.s32.totalorder %s207_s6, %s207_s6 }
  0x1c   :  { %p214_p0 = por %p213_p13, %p212_p12 }
  0x1e   :  { %p215_p1 = pnand %p214_p0, %p208_p11 }
  0x20   :  { %218 = shalt.err (!%p215_p1)
}
  0x21   :  { %s249_s0 = smov 128   ;;  %s250_s7 = smov 8  }
  0x22   :  { %32 = dma.hbm_to_vmem [thread:$0]  %s322_s1, 384, %s275_s15, [#allocation6], %s249_s0, %s249_s0, %s250_s7  }
  0x23   :  { %241 = dma.done.wait [#allocation3], 128  }
  0x24   :  { %242 = vsyncadd [#allocation3], 4294967168 }
  0x25   :  { %243 = dma.done.wait [#allocation6], 384  }
  0x26   :  { %244 = vsyncadd [#allocation6], 4294966912  ;;  %v251_v0 = vmov 0.0|0.0   ;;  %vm252_vm0 = vmmov 0   ;;  %v253_v1 = vmov 0.0   ;;  %v42_v2 = vld [vmem:[#allocation5] sm:$0xff] }
  0x27   :  { %164 = vmatprep.subr.bf16.mxu0 %v251_v0  ;;  %161 = vmatprep.mubr.msk.f32.mxu0 %vm252_vm0, %v253_v1  ;;  %v43_v3 = vld [vmem:[#allocation5 + $0x8] sm:$0xff]  ;;  %v44_v5 = vld [vmem:[#allocation5 + $0x10] sm:$0xf]  ;;  %vm56_vm1 = vcmask 1043456   ;;  %v41_v6 = vld [vmem:[#allocation2] sm:$0xff]  ;;  %vm52_vm2 = vcmask 162816  }
  0x28   :  { %v165_v4 = vpack.c.bf16 %v43_v3, %v42_v2  ;;  %v148_v7 = vld [vmem:[%s323_s2] ss:$0 sm:$0xff]  ;;  %s254_s11 = smov [#allocation7]   ;;  %vm130_vm3 = vcmask 261120  }
  0x29   :  { %s138_s12 = sshll.u32 %s254_s11, 4  ;;  %s139_s12 = int_to_ptr.vmem [resolvable:$true] %s138_s12 }
  0x2a   :  { %166 = vmatpush3.bf16.msra.mxu0 %v165_v4  ;;  %s219_s13 = scalar_lea.vmem %s139_s12, 128  ;;  %p224_p3 = scmp.lt.s32.totalorder %s139_s12, %s139_s12 }
  0x2b   :  { %159 = vmatprep.subr.mxu0 %v253_v1  ;;  %p220_p2 = scmp.ne.s32.totalorder %s139_s12, %s219_s13  ;;  %p225_p4 = scmp.lt.s32.totalorder %s219_s13, %s219_s13 }
  0x2d   :  { %p226_p5 = por %p225_p4, %p224_p3 }
  0x2e   :  { %160 = vmatpush3.msk.msra.mxu0 %vm56_vm1, %v44_v5 }
  0x2f   :  { %162 = vmatmul.mubr.msk.f32.vlgmr.msra.gmra.mrb[0].mxu0 %vm52_vm2, %v41_v6  ;;  %p227_p6 = pnand %p226_p5, %p220_p2 }
 0x102   :  { %v126_v8 = vpop.f32.mrb[0].mxu0 }
 0x103   :  { %v127_v9 = vadd.f32 %v148_v7, %v126_v8  ;;  %v163_v10 = vpop.f32.mrb[1].mxu0 }
 0x105   :  { %131 = vst.msk [vmem:[#allocation7] sm:$0xff] %vm130_vm3, %v127_v9 }
 0x106   :  { %230 = shalt.err (!%p227_p6)
}
 0x107   :  { %s231_s16 = scalar_lea.hbm %s324_s3, 128 }
 0x108   :  { %p232_p7 = scmp.ne.s32.totalorder %s324_s3, %s231_s16  ;;  %p235_p8 = scmp.lt.u32.totalorder %s231_s16, %s324_s3 }
 0x10a   :  { %p237_p9 = pnand %p235_p8, %p232_p7 }
 0x10c   :  { %240 = shalt.err (!%p237_p9)
}
 0x10d   :  { %141 = dma.vmem_to_hbm [thread:$0]  %s139_s12, 128, %s324_s3, [#allocation4]  }
 0x10e   :  { %245 = dma.done.wait [#allocation4], 128  }
 0x10f   :  { %246 = vsyncadd [#allocation4], 4294967168 }
 0x110   :  { %145 = vsyncpa [#allocation3], 1 }
 0x111   :  { %146 = vsyncpa [#allocation6], 1 }
 0x112   :  { %147 = vsyncpa [#allocation4], 1 }

</bundles_post_ra>
